<compile_context>
chip_gen: v7x
topology: tpu7x:2x2x1
jax: 0.10.0
libtpu: 0.0.40
codegen_flags: <defaults>
</compile_context>

<pallas_src>
import numpy as np
import jax
import jax.numpy as jnp
from jax import lax
from jax.experimental import pallas as pl
from jax.experimental.pallas import tpu as pltpu

LANE = 128
_MIN_PALLAS_BYTES = 64 << 10   # below this, XLA's fused gather+fma wins (launch overhead)


def _cdiv(a, b):
    return (a + b - 1) // b


def _vmem_budget():
    """Return (per-pipeline-buffer byte budget, physical VMEM capacity)."""
    cap = 64 << 20                       # conservative default: v7x per-core VMEM
    try:
        info = pltpu.get_tpu_info()
        cap = int(getattr(info, "vmem_capacity_bytes", cap))
    except Exception:
        pass
    # 4 buffers in flight (2 in + 2 out); keep them comfortably under half of physical.
    per_buf = max(1 << 20, min(4 << 20, (cap // 2 - (2 << 20)) // 4))
    return per_buf, cap


def _vmem_limit(buffer_bytes, cap):
    return int(min(max(16 << 20, buffer_bytes + (4 << 20)),
                   max(16 << 20, cap // 2)))


# ------------------------------------------------------------------ kernels

def _mixup_stripe_kernel(shuffle_ref, lam_ref, x_ref, o_ref):
    """One (B, TS, 128) stripe of every batch row.  Partner rows are gathered from the
    same VMEM-resident input block -> each element is read once and written once."""
    B = x_ref.shape[0]

    def body(i, c):
        lam = lam_ref[i]
        j = shuffle_ref[i]
        a = x_ref[i].astype(jnp.float32)
        b = x_ref[j].astype(jnp.float32)
        o_ref[i] = (lam * a + (1.0 - lam) * b).astype(o_ref.dtype)
        return c

    lax.fori_loop(0, B, body, 0)


def _mixup_rows_kernel(shuffle_ref, lam_ref, x_ref, x_shuf_ref, o_ref):
    """Huge-batch fallback: per-row tiles; partner tile streamed via index_map gather."""
    i = pl.program_id(0)
    lam = lam_ref[i]
    a = x_ref[...].astype(jnp.float32)
    b = x_shuf_ref[...].astype(jnp.float32)
    o_ref[...] = (lam * a + (1.0 - lam) * b).astype(o_ref.dtype)


# ------------------------------------------------------------------ wrappers

def _call_stripe(x3, shuffle_idx, lam, out_dtype, pack, item_in, item_out, budget, cap):
    B, S, _ = x3.shape
    item_max = max(item_in, item_out)

    per_sublane = B * LANE * item_max
    ts = max(1, budget // per_sublane)
    ts = max(pack, (min(ts, S) // pack) * pack)
    # Keep >= 4 grid steps for megacore sharding when the tensor is large enough.
    if _cdiv(S, ts) < 4 and S >= 4 * pack:
        ts = max(pack, (S // 4 // pack) * pack)
    nS = _cdiv(S, ts)

    in_block = B * ts * LANE * item_in
    out_block = B * ts * LANE * item_out
    limit = _vmem_limit(2 * (in_block + out_block), cap)

    grid_spec = pltpu.PrefetchScalarGridSpec(
        num_scalar_prefetch=2,               # shuffle_idx, lambda
        grid=(nS,),
        in_specs=[pl.BlockSpec((B, ts, LANE), lambda s, sh, lm: (0, s, 0))],
        out_specs=pl.BlockSpec((B, ts, LANE), lambda s, sh, lm: (0, s, 0)),
    )
    return pl.pallas_call(
        _mixup_stripe_kernel,
        out_shape=jax.ShapeDtypeStruct((B, S, LANE), out_dtype),
        grid_spec=grid_spec,
        compiler_params=pltpu.CompilerParams(
            dimension_semantics=("parallel",),
            vmem_limit_bytes=limit),
        cost_estimate=pl.CostEstimate(
            flops=int(3 * B * S * LANE),
            transcendentals=0,
            bytes_accessed=int(B * S * LANE * (item_in + item_out))),
    )(shuffle_idx.astype(jnp.int32), lam.astype(jnp.float32), x3)


def _call_rows(x3, shuffle_idx, lam, out_dtype, pack, item_in, item_out, budget, cap):
    B, S, _ = x3.shape
    item_max = max(item_in, item_out)

    ts = max(1, budget // (LANE * item_max))
    ts = max(pack, (min(ts, S) // pack) * pack)
    nS = _cdiv(S, ts)

    in_block = ts * LANE * item_in
    out_block = ts * LANE * item_out
    limit = _vmem_limit(4 * in_block + 2 * out_block, cap)

    grid_spec = pltpu.PrefetchScalarGridSpec(
        num_scalar_prefetch=2,
        grid=(B, nS),
        in_specs=[
            pl.BlockSpec((1, ts, LANE), lambda i, s, sh, lm: (i, s, 0)),
            pl.BlockSpec((1, ts, LANE), lambda i, s, sh, lm: (sh[i], s, 0)),
        ],
        out_specs=pl.BlockSpec((1, ts, LANE), lambda i, s, sh, lm: (i, s, 0)),
    )
    return pl.pallas_call(
        _mixup_rows_kernel,
        out_shape=jax.ShapeDtypeStruct((B, S, LANE), out_dtype),
        grid_spec=grid_spec,
        compiler_params=pltpu.CompilerParams(
            dimension_semantics=("parallel", "parallel"),
            vmem_limit_bytes=limit),
        cost_estimate=pl.CostEstimate(
            flops=int(3 * B * S * LANE),
            transcendentals=0,
            bytes_accessed=int(B * S * LANE * (2 * item_in + item_out))),
    )(shuffle_idx.astype(jnp.int32), lam.astype(jnp.float32), x3, x3)


def _mixup_jnp(arr, shuffle_idx, lam, out_dtype):
    lam_b = lam.astype(jnp.float32).reshape((-1,) + (1,) * (arr.ndim - 1))
    a = arr.astype(jnp.float32)
    return (lam_b * a + (1.0 - lam_b) * a[shuffle_idx]).astype(out_dtype)


def _mixup_pallas(arr, shuffle_idx, lam, out_dtype):
    orig_shape = arr.shape
    B = orig_shape[0]
    D = int(np.prod(orig_shape[1:])) if arr.ndim > 1 else 1

    flat = arr.reshape(B, D)                      # contiguous reshape: no HBM copy
    Dp = _cdiv(D, LANE) * LANE
    if Dp != D:
        # TODO(synk): ragged tails still take a pad + slice round trip; an aligned-prefix
        # kernel + jnp tail needs a concat of equal cost, so this stays until a masked
        # 2-D (B, D) block path is validated.
        flat = jnp.pad(flat, ((0, 0), (0, Dp - D)))
    S = Dp // LANE
    x3 = flat.reshape(B, S, LANE)

    item_in = jnp.dtype(flat.dtype).itemsize
    item_out = jnp.dtype(out_dtype).itemsize
    pack = 8 * max(1, 4 // max(1, min(item_in, item_out)))   # native sublane packing
    budget, cap = _vmem_budget()

    if B * pack * LANE * max(item_in, item_out) > budget:
        out = _call_rows(x3, shuffle_idx, lam, out_dtype, pack, item_in, item_out, budget, cap)
    else:
        out = _call_stripe(x3, shuffle_idx, lam, out_dtype, pack, item_in, item_out, budget, cap)

    out = out.reshape(B, Dp)
    if Dp != D:
        out = out[:, :D]
    return out.reshape(orig_shape)


def _mixup(arr, shuffle_idx, lam):
    arr = jnp.asarray(arr)
    # Float tensors keep their dtype; anything else is promoted to f32 (matches torch's
    # float-lambda * tensor promotion instead of truncating back to int).
    out_dtype = arr.dtype if jnp.issubdtype(arr.dtype, jnp.floating) else jnp.float32
    D = int(np.prod(arr.shape[1:])) if arr.ndim > 1 else 1
    total_bytes = arr.shape[0] * D * jnp.dtype(arr.dtype).itemsize
    if D < LANE or total_bytes < _MIN_PALLAS_BYTES:
        return _mixup_jnp(arr, shuffle_idx, lam, out_dtype)
    return _mixup_pallas(arr, shuffle_idx, lam, out_dtype)


class Mixup:
    """JAX / Pallas port of padertorch Mixup.  Randomness drawn from a JAX key."""

    def __init__(self, p, alpha=1.0, training=True):
        self.p = p
        self.alpha = alpha
        self.training = training

    def __call__(self, x, targets=None, seq_len=None, *, rng):
        if not self.training:
            return x, targets, seq_len, None, None

        B = x.shape[0]
        k_shift, k_bern, k_beta = jax.random.split(rng, 3)

        # shuffle_idx = np.roll(np.arange(B), shift)  ->  idx[i] = (i - shift) % B
        shift = jax.random.randint(k_shift, (), 0, B)
        shuffle_idx = (jnp.arange(B, dtype=jnp.int32) - shift) % B

        bern = jax.random.bernoulli(k_bern, 1.0 - self.p, (B,)).astype(jnp.float32)
        beta = jax.random.beta(k_beta, self.alpha, self.alpha, (B,)).astype(jnp.float32)
        lam = jnp.maximum(bern, beta)

        if seq_len is not None:
            seq_len = jnp.asarray(seq_len, dtype=jnp.int32)
            seq_len = jnp.maximum(
                seq_len, (lam < 1.0).astype(jnp.int32) * seq_len[shuffle_idx])

        x = _mixup(x, shuffle_idx, lam)

        if isinstance(targets, (list, tuple)):
            targets = [_mixup(t, shuffle_idx, lam) for t in targets]
        elif targets is not None:
            targets = _mixup(targets, shuffle_idx, lam)

        return x, targets, seq_len, shuffle_idx, lam   # extra returns for verification


def _np_ref(xn, shn, lmn):
    lam_x = lmn[(...,) + (xn.ndim - 1) * (None,)]
    return lam_x * xn + (1.0 - lam_x) * xn[shn]


if __name__ == "__main__":
    key = jax.random.PRNGKey(0)
    k1, k2, k3, k4, kr1, kr2, kr3, kr4 = jax.random.split(key, 8)

    # ---- Case 1: small f32 NCHW + tiny one-hot targets + seq_len (jnp path) ----
    B, C, H, W = 4, 4, 16, 16
    x = jax.random.normal(k1, (B, C, H, W), dtype=jnp.float32)
    targets = jnp.eye(B, dtype=jnp.float32)
    seq_len = jnp.array([3, 4, 5, 6], dtype=jnp.int32)

    x_mix, t_mix, sl_out, sh, lm = Mixup(p=1.0, alpha=1.0)(
        x, targets=targets, seq_len=seq_len, rng=kr1)
    jax.block_until_ready((x_mix, t_mix, sl_out))

    xn, tn = np.asarray(x), np.asarray(targets)
    shn, lmn = np.asarray(sh), np.asarray(lm)
    assert np.allclose(np.asarray(x_mix), _np_ref(xn, shn, lmn), atol=1e-5), "case1 x mismatch"
    assert np.allclose(np.asarray(t_mix), _np_ref(tn, shn, lmn), atol=1e-5), "case1 t mismatch"
    sl_ref = np.maximum(np.asarray(seq_len), (lmn < 1.0) * np.asarray(seq_len)[shn])
    assert np.array_equal(np.asarray(sl_out), sl_ref.astype(np.int32)), "case1 seq_len mismatch"

    # ---- Case 2: tiny bf16 ragged tensor (jnp path) ----
    x2 = jax.random.normal(k2, (3, 5, 7, 33), dtype=jnp.bfloat16)
    x2_mix, _, _, sh2, lm2 = Mixup(p=0.5, alpha=0.4)(x2, rng=kr2)
    jax.block_until_ready(x2_mix)
    assert x2_mix.dtype == jnp.bfloat16
    ref2 = _np_ref(np.asarray(x2, np.float32), np.asarray(sh2), np.asarray(lm2))
    assert np.allclose(np.asarray(x2_mix.astype(jnp.float32)), ref2,
                       atol=2e-2, rtol=2e-2), "case2 x mismatch"

    # ---- Case 3: f32, lane-aligned D (Pallas stripe path, multi-step grid) ----
    x3 = jax.random.normal(k3, (8, 8, 32, 64), dtype=jnp.float32)      # D = 16384
    x3_mix, _, _, sh3, lm3 = Mixup(p=1.0, alpha=0.2)(x3, rng=kr3)
    jax.block_until_ready(x3_mix)
    ref3 = _np_ref(np.asarray(x3), np.asarray(sh3), np.asarray(lm3))
    assert np.allclose(np.asarray(x3_mix), ref3, atol=1e-5), "case3 x mismatch"

    # ---- Case 4: bf16, ragged D (Pallas stripe path + pad/slice + edge block) ----
    x4 = jax.random.normal(k4, (8, 6, 50, 33), dtype=jnp.bfloat16)     # D = 9900
    x4_mix, _, _, sh4, lm4 = Mixup(p=0.5, alpha=1.0)(x4, rng=kr4)
    jax.block_until_ready(x4_mix)
    assert x4_mix.dtype == jnp.bfloat16
    ref4 = _np_ref(np.asarray(x4, np.float32), np.asarray(sh4), np.asarray(lm4))
    assert np.allclose(np.asarray(x4_mix.astype(jnp.float32)), ref4,
                       atol=2e-2, rtol=2e-2), "case4 x mismatch"

    print("KERNEL_OK")
</pallas_src>

<mosaic_0001>
module attributes {stable_mosaic.version = 11 : i64} {
  func.func @_mixup_stripe_kernel(%arg0: i32, %arg1: memref<8xi32, #tpu.memory_space<smem>>, %arg2: memref<8xf32, #tpu.memory_space<smem>>, %arg3: memref<8x32x128xf32, #tpu.memory_space<vmem>>, %arg4: memref<8x32x128xf32, #tpu.memory_space<vmem>>) attributes {dimension_semantics = [#tpu.dimension_semantics<parallel>], iteration_bounds = array<i64: 4>, scalar_prefetch = 2 : i64, scratch_operands = 0 : i64, tpu.core_type = #tpu.core_type<tc>, window_params = [{transform_indices = @transform_0, window_bounds = array<i64: 8, 32, 128>}, {transform_indices = @transform_1, window_bounds = array<i64: 8, 32, 128>}]} {
    %c0_i32 = arith.constant 0 : i32
    %c8_i32 = arith.constant 8 : i32
    %0 = arith.addi %c0_i32, %c8_i32 : i32
    %c1_i32 = arith.constant 1 : i32
    scf.for %arg5 = %c0_i32 to %0 step %c1_i32  : i32 {
      %1 = arith.index_cast %arg5 : i32 to index
      %2 = memref.load %arg2[%1] : memref<8xf32, #tpu.memory_space<smem>>
      %3 = arith.index_cast %arg5 : i32 to index
      %4 = memref.load %arg1[%3] : memref<8xi32, #tpu.memory_space<smem>>
      %5 = arith.index_cast %arg5 : i32 to index
      %c0 = arith.constant 0 : index
      %c0_1 = arith.constant 0 : index
      %6 = vector.load %arg3[%5, %c0, %c0_1] : memref<8x32x128xf32, #tpu.memory_space<vmem>>, vector<1x32x128xf32>
      %7 = vector.shape_cast %6 : vector<1x32x128xf32> to vector<32x128xf32>
      %8 = arith.index_cast %4 : i32 to index
      %c0_2 = arith.constant 0 : index
      %c0_3 = arith.constant 0 : index
      %9 = vector.load %arg3[%8, %c0_2, %c0_3] : memref<8x32x128xf32, #tpu.memory_space<vmem>>, vector<1x32x128xf32>
      %10 = vector.shape_cast %9 : vector<1x32x128xf32> to vector<32x128xf32>
      %11 = vector.broadcast %2 : f32 to vector<32x128xf32>
      %12 = arith.mulf %11, %7 : vector<32x128xf32>
      %cst = arith.constant 1.000000e+00 : f32
      %13 = arith.subf %cst, %2 : f32
      %14 = vector.broadcast %13 : f32 to vector<32x128xf32>
      %15 = arith.mulf %14, %10 : vector<32x128xf32>
      %16 = arith.addf %12, %15 : vector<32x128xf32>
      %17 = arith.index_cast %arg5 : i32 to index
      %c0_4 = arith.constant 0 : index
      %c0_5 = arith.constant 0 : index
      %18 = vector.load %arg4[%17, %c0_4, %c0_5] : memref<8x32x128xf32, #tpu.memory_space<vmem>>, vector<1x32x128xf32>
      %19 = vector.shape_cast %18 : vector<1x32x128xf32> to vector<32x128xf32>
      %20 = vector.shape_cast %16 : vector<32x128xf32> to vector<1x32x128xf32>
      tpu.vector_store %arg4[%17, %c0_4, %c0_5], %20 {strides = array<i32>} : memref<8x32x128xf32, #tpu.memory_space<vmem>>, vector<1x32x128xf32>,
    }
    %c8_i32_0 = arith.constant 8 : i32
    return
  }
  func.func @transform_0(%arg0: i32, %arg1: memref<8xi32, #tpu.memory_space<smem>>, %arg2: memref<8xf32, #tpu.memory_space<smem>>) -> (i32, i32, i32) {
    %c0_i32 = arith.constant 0 : i32
    %c0_i32_0 = arith.constant 0 : i32
    %c0_i32_1 = arith.constant 0 : i32
    return %c0_i32, %arg0, %c0_i32_0 : i32, i32, i32
  }
  func.func @transform_1(%arg0: i32, %arg1: memref<8xi32, #tpu.memory_space<smem>>, %arg2: memref<8xf32, #tpu.memory_space<smem>>) -> (i32, i32, i32) {
    %c0_i32 = arith.constant 0 : i32
    %c0_i32_0 = arith.constant 0 : i32
    %c0_i32_1 = arith.constant 0 : i32
    return %c0_i32, %arg0, %c0_i32_0 : i32, i32, i32
  }
}

</mosaic_0001>

<bundles_post_ra>
// kernel: tpu_custom_call.1
= control target key start
LH: loop header
LB: loop body
LE: loop exit
PB: predicated region body
PF: predicated region fallthrough
CT: control target
= control target key end

     0   :  { %s702_s0 = inlined_call_operand.hbm [shape: s32[8], index: 0, kind: input, shape index: {}]   ;;  %s703_s2 = inlined_call_operand.hbm [shape: f32[8,128,128], index: 2, kind: input, shape index: {}]   ;;  %s704_s3 = inlined_call_operand.hbm [shape: f32[8,128,128], index: 3, kind: output, shape index: {}]   ;;  %s705_s1 = inlined_call_operand.vmem [shape: f32[8], index: 1, kind: input, shape index: {}]  }
   0x1   :  { %s436_s14 = scalar_lea.hbm %s702_s0, 16 }
   0x2   :  { %p437_p0 = scmp.ne.s32.totalorder %s702_s0, %s436_s14  ;;  %p440_p1 = scmp.lt.u32.totalorder %s436_s14, %s702_s0 }
   0x4   :  { %p442_p2 = pnand %p440_p1, %p437_p0 }
   0x6   :  { %445 = shalt.err (!%p442_p2)  }
   0x7   :  { %s508_s19 = smov [#allocation3]   ;;  %s10_s24 = sshll.u32 %s705_s1, 4  ;;  %s11_s24 = int_to_ptr.vmem [resolvable:$true] %s10_s24 }
   0x8   :  { %9 = dma.hbm_to_smem %s702_s0, 16, %s508_s19, [#allocation2] }
   0x9   :  { %s446_s25 = scalar_lea.vmem %s11_s24, 16  ;;  %p451_p4 = scmp.lt.s32.totalorder %s11_s24, %s11_s24 }
   0xa   :  { %p447_p3 = scmp.ne.s32.totalorder %s11_s24, %s446_s25  ;;  %p452_p5 = scmp.lt.s32.totalorder %s446_s25, %s446_s25 }
   0xc   :  { %p453_p6 = por %p452_p5, %p451_p4 }
   0xe   :  { %p454_p7 = pnand %p453_p6, %p447_p3 }
  0x10   :  { %457 = shalt.err (!%p454_p7)  }
  0x11   :  { %s509_s26 = smov [#allocation4]  }
  0x12   :  { %13 = dma.vmem_to_smem %s11_s24, 16, %s509_s26, [#allocation2] }
  0x13   :  { %478 = dma.done.wait [#allocation2], 32 }
  0x14   :  { %479 = vsyncadd [#allocation2], 4294967264 }
  0x15   :  { %15 = sfence }
  0x16   :  { %16 = vsyncpa [#allocation6], 0 }
  0x17   :  { %18 = vsyncpa [#allocation6 + $0x1], 0 }
  0x18   :  { %19 = vsyncpa [#allocation7], 0 }
  0x19   :  { %21 = vsyncpa [#allocation7 + $0x1], 0  ;;  %s558_s0 = smov 0   ;;  %s560_s1 = smov 0  }
  0x1a   :  { %s562_s27 = smov 0   ;;  %s564_s28 = smov 0  }
  0x1b LB: > { %s579_s29 = sadd.s32 4294967295, %s502_s28   ;;  %s339_s30 = sadd.s32 4294967294, %s502_s28   ;;  %s502_s28 = sphi %s564_s28, %s713_s28   ;;  %s498_s27 = sphi %s562_s27, %s712_s27   ;;  %s494_s1 = sphi %s560_s1, %s711_s1   ;;  %s490_s0 = sphi %s558_s0, %s710_s0  }
  0x1c   : > { %s583_s4 = sadd.s32 1, %s502_s28   ;;  %s34_s5 = sadd.s32 1, %s498_s27 }
  0x1d   : > { %s31_s6 = ssub.s32 %s502_s28, %s583_s4  ;;  %p41_p8 = scmp.ne.s32.totalorder %s498_s27, %s494_s1 }
  0x1e   : > { %p32_p9 = scmp.eq.s32.totalorder %s31_s6, 0  ;;  %p42_p10 = scmp.eq.s32.totalorder %s502_s28, 0 }
  0x1f   : > { %p47_p11 = scmp.ne.s32.totalorder %s494_s1, %s490_s0  ;;  %p48_p12 = scmp.eq.s32.totalorder %s579_s29, 0 }
  0x20   : > { %s595_s7 = scalar_select %p32_p9, %s498_s27, %s34_s5  }
  0x21   : > { %p597_p13 = por %p42_p10, %p41_p8  ;;  %p601_p0 = por %p48_p12, %p47_p11 }
  0x22   : > { %p71_p1 = scmp.eq.s32.totalorder %s579_s29, 3  ;;  %p77_p2 = scmp.eq.s32.totalorder %s339_s30, 3 }
  0x23   : > { %p341_p5 = scmp.ge.s32.totalorder %s502_s28, 4 }
  0x24   : > { %p606_p3 = por %p71_p1, %p41_p8  ;;  %p610_p4 = por %p77_p2, %p47_p11 }
  0x25   : > { %93 = sbr.rel (%p341_p5) target bundleno = 57 (0x39), region = 16 }
  0x2c   : > { %s97_s12 = sand.u32 1, %s498_s27   ;;  %s357_s13 = sshll.u32 %s502_s28, 9 }
  0x2d   : > { %s342_s14 = sshll.u32 %s97_s12, 8  ;;  %s107_s17 = scalar_lea.hbm %s703_s2, %s357_s13 }
  0x2e   : > { %s359_s18 = scalar_select %p597_p13, [#allocation0], [#allocation13] }
  0x2f   : > { %s101_s19 = scalar_lea.vmem [#allocation5], %s342_s14  ;;  %s510_s22 = smov 2048  }
  0x30   : > { %s120_s20 = sshll.u32 %s101_s19, 4  ;;  %s112_s21 = sld [smem:[%s359_s18]]   ;;  %s121_s20 = int_to_ptr.vmem [resolvable:$true] %s120_s20 }
  0x31   : > { %360 = sst [smem:[#allocation10]] (%p597_p13), %s510_s22  ;;  %s511_s23 = smov 512  }
  0x32   : > { %361 = sst [smem:[#allocation10 + $0x1]] (%p597_p13), %s511_s23  ;;  %s512_s24 = smov 4  }
  0x33   : > { %362 = sst [smem:[#allocation10 + $0x2]] (%p597_p13), %s512_s24  ;;  %s513_s25 = smov 128  }
  0x34   : > { %363 = sst [smem:[#allocation10 + $0x3]] (%p597_p13), %s513_s25  ;;  %s514_s30 = smov 8  }
  0x35   : > { %364 = sst [smem:[#allocation10 + $0x4]] (%p597_p13), %s513_s25  ;;  %s98_s6 = scalar_lea.sflag [#allocation6], %s97_s12 }
  0x36   : > { %s345_s26 = sshll.u32 %s112_s21, 26  ;;  %365 = sst [smem:[#allocation10 + $0x5]] (%p597_p13), %s514_s30 }
  0x37   : > { %s346_s5 = sadd.s32 134217728, %s345_s26  ;;  %s515_s13 = smov [#allocation9]  }
  0x38   : > { %366 = dma.general (%p597_p13), %s107_s17, 4096, %s121_s20, %s98_s6, %s515_s13, [#allocation10], %s346_s5, 0  }
  0x39 PF: > { %p347_p6 = scmp.ge.s32.totalorder %s502_s28, 1  ;;  %p141_p7 = scmp.lt.s32.totalorder %s502_s28, 5 }
  0x3b   : > { %p142_p8 = pnand %p347_p6, %p141_p7 }
  0x3c   : > { %s639_s14 = sand.u32 (!%p142_p8), 1, %s494_s1  }
  0x3d   : > { %145 = sbr.rel (%p142_p8) target bundleno = 95 (0x5f), region = 24  ;;  %s348_s15 = sshll.u32 (!%p142_p8), %s639_s14, 8 }
  0x3e   : > { %s148_s16 = scalar_lea.sflag (!%p142_p8), [#allocation6], %s639_s14  ;;  %s643_s18 = scalar_lea.vmem (!%p142_p8), [#allocation5], %s348_s15 }
  0x44   : > { %481 = dma.done.wait (%p601_p0), %s148_s16, 4096  }
  0x45   : > { %483 = vsyncadd (%p601_p0), %s148_s16, 4294963200  ;;  %s649_s8 = scalar_lea.vmem [#allocation8], %s348_s15  ;;  %s651_s12 = smov 0  }
  0x46 LB: >> { %s178_s17 = sld [smem:[#allocation4 + %s506_s12]]  ;;  %s350_s20 = sshll.u32 %s506_s12, 5  ;;  %s506_s12 = sphi %s651_s12, %s177_s12  }
  0x47   : >> { %s179_s19 = sld [smem:[#allocation3 + %s506_s12]]  ;;  %s181_s21 = scalar_lea.vmem %s643_s18, %s350_s20 [#allocation5] }
  0x48   : >> { %v182_v0 = vld [vmem:[%s181_s21] sm:$0xff]  ;;  %v183_v1 = vld [vmem:[%s181_s21 + $0x8] sm:$0xff]  ;;  %v184_v2 = vld [vmem:[%s181_s21 + $0x10] sm:$0xff]  ;;  %s207_s24 = scalar_lea.vmem %s649_s8, %s350_s20 [#allocation8]  ;;  %s177_s12 = sadd.s32 1, %s506_s12  }
  0x49   : >> { %v185_v3 = vld [vmem:[%s181_s21 + $0x18] sm:$0xff]  ;;  %p174_p9 = scmp.ge.s32.totalorder %s177_s12, 8  }
  0x4a   : > { %s213_s25 = scalar_lea.sflag (%p174_p9), [#allocation7], %s639_s14 }
  0x4c   : >> { %v192_v4 = vstv %s178_s17  ;;  %s197_s22 = ssub.f32 1.0, %s178_s17 }
  0x4d   : >> { %s351_s9 = sshll.u32 %s179_s19, 5  ;;  %v193_v5 = vmul.f32 %v192_v4, %v182_v0  ;;  %v194_v6 = vmul.f32 %v192_v4, %v183_v1  ;;  %v195_v7 = vmul.f32 %v192_v4, %v184_v2  ;;  %v196_v12 = vmul.f32 %v192_v4, %v185_v3 }
  0x4e   : >> { %s187_s23 = scalar_lea.vmem %s643_s18, %s351_s9 [#allocation5]  ;;  %v198_v9 = vstv %s197_s22 }
  0x4f   : >> { %v188_v8 = vld [vmem:[%s187_s23] sm:$0xff]  ;;  %v189_v10 = vld [vmem:[%s187_s23 + $0x8] sm:$0xff]  ;;  %v190_v11 = vld [vmem:[%s187_s23 + $0x10] sm:$0xff]  ;;  %176 = sbr.rel (!%p174_p9) target bundleno = 70 (0x46), region = 89 }
  0x50   : >> { %v199_v13 = vmul.f32 %v198_v9, %v188_v8  ;;  %v200_v14 = vmul.f32 %v198_v9, %v189_v10  ;;  %v201_v15 = vmul.f32 %v198_v9, %v190_v11  ;;  %v191_v16 = vld [vmem:[%s187_s23 + $0x18] sm:$0xff] }
  0x51   : >> { %v202_v17 = vmul.f32 %v198_v9, %v191_v16 }
  0x52   : >> { %v203_v18 = vadd.f32 %v199_v13, %v193_v5  ;;  %v204_v19 = vadd.f32 %v200_v14, %v194_v6  ;;  %v205_v20 = vadd.f32 %v201_v15, %v195_v7 }
  0x53   : >> { %v206_v21 = vadd.f32 %v202_v17, %v196_v12 }
  0x54   : >> { %208 = vst [vmem:[%s207_s24] sm:$0xff] %v203_v18  ;;  %209 = vst [vmem:[%s207_s24 + $0x8] sm:$0xff] %v204_v19 }
  0x55   : >> { %210 = vst [vmem:[%s207_s24 + $0x10] sm:$0xff] %v205_v20  ;;  %211 = vst [vmem:[%s207_s24 + $0x18] sm:$0xff] %v206_v21 }
  0x56   : > { %s358_s26 = sshll.u32 %s579_s29, 9  ;;  %s242_s30 = sshll.u32 %s649_s8, 4  ;;  %s243_s30 = int_to_ptr.vmem [resolvable:$true] %s242_s30 }
  0x57   : > { %s225_s13 = scalar_lea.hbm %s704_s3, %s358_s26  ;;  %s516_s15 = smov 512  }
  0x58   : > { %368 = sst [smem:[#allocation12]] (%p606_p3), %s516_s15  ;;  %s517_s14 = smov 2048  }
  0x59   : > { %369 = sst [smem:[#allocation12 + $0x1]] (%p606_p3), %s517_s14  ;;  %s518_s16 = smov 4  }
  0x5a   : > { %370 = sst [smem:[#allocation12 + $0x2]] (%p606_p3), %s518_s16  ;;  %s519_s18 = smov 128  }
  0x5b   : > { %371 = sst [smem:[#allocation12 + $0x3]] (%p606_p3), %s519_s18  ;;  %s520_s29 = smov 8  }
  0x5c   : > { %372 = sst [smem:[#allocation12 + $0x4]] (%p606_p3), %s519_s18  ;;  %s521_s8 = smov [#allocation11]  }
  0x5d   : > { %373 = sst [smem:[#allocation12 + $0x5]] (%p606_p3), %s520_s29  ;;  %s522_s12 = smov 0  }
  0x5e   : > { %374 = dma.general (%p606_p3), %s243_s30, 4096, %s225_s13, %s213_s25, %s521_s8, [#allocation12], %s522_s12, 0  }
  0x5f PF: > { %p380_p10 = scmp.ge.s32.totalorder %s502_s28, 2  ;;  %s270_s17 = sand.u32 1, %s490_s0  }
  0x60   : > { %s271_s19 = scalar_lea.sflag [#allocation7], %s270_s17 }
  0x61   : > { %p377_p11 = pnand %p380_p10, %p610_p4 }
  0x63   : > { %485 = dma.done.wait (!%p377_p11), %s271_s19, 4096  }
  0x64   : > { %487 = vsyncadd (!%p377_p11), %s271_s19, 4294963200  ;;  %p24_p12 = scmp.ge.s32.totalorder %s583_s4, 6   ;;  %s710_s0 = smov %s494_s1 }
  0x65   : > { %s711_s1 = smov %s498_s27  ;;  %s712_s27 = smov %s595_s7 }
  0x66   : > { %s713_s28 = smov %s583_s4  ;;  %26 = sbr.rel (!%p24_p12) target bundleno = 27 (0x1b), region = 100 }
  0x6d   :  { %276 = vsyncpa [#allocation6], 1 }
  0x6e   :  { %278 = vsyncpa [#allocation6 + $0x1], 1 }
  0x6f   :  { %279 = vsyncpa [#allocation7], 1 }
  0x70   :  { %281 = vsyncpa [#allocation7 + $0x1], 1 }

</bundles_post_ra>
